<compile_context>
chip_gen: v6e
topology: v6e:2x2x1
jax: 0.10.0
libtpu: 0.0.40
codegen_flags: <defaults>
</compile_context>

<pallas_src>
import jax
import jax.numpy as jnp
from jax.experimental import pallas as pl
from jax.experimental.pallas import tpu as pltpu


def _gate_kernel(x_ref, g_ref, o_ref):
    # sigmoid of the small (1, tile_f) gate tile in f32 (EUP), cast once to the
    # compute dtype, then a native-dtype broadcast multiply (VPU).
    g = jax.nn.sigmoid(g_ref[...].astype(jnp.float32)).astype(x_ref.dtype)
    o_ref[...] = x_ref[...] * g


def _cdiv(a, b):
    return -(-a // b)


def _round_up(v, m):
    return _cdiv(v, m) * m


def _round_down(v, m):
    return (v // m) * m


def gate_forward(x, gate_param):
    """x: (..., size); gate_param: (size,). Returns x * sigmoid(gate_param)."""
    size = gate_param.shape[-1]
    assert x.shape[-1] == size, "last axis of x must match gate size"
    orig_shape = x.shape
    x2d = x.reshape(-1, size)              # flatten leading dims -> (B, size)
    B = x2d.shape[0]

    itemsize = jnp.dtype(x2d.dtype).itemsize
    sublane = {4: 8, 2: 16, 1: 32}.get(itemsize, 8)

    # Lane-dense feature tile: a multiple of 128 (the edge block is masked if
    # size isn't a multiple), capped at 2048 lanes.
    tile_f = min(_round_up(size, 128), 2048)

    # Batch tile from a ~4 MiB byte budget per x block.  With in + out double
    # buffered that's ~16 MiB of VMEM, admitted by the explicit 32 MiB limit
    # below on every generation.
    block_budget = 4 * 1024 * 1024
    tile_b = max(sublane, _round_down(block_budget // (tile_f * itemsize), sublane))
    tile_b = min(tile_b, _round_up(B, sublane))   # never bigger than padded B

    # Guarantee some pipeline depth (matters most on v7x where the grid is
    # split across two TensorCores): halve tile_b until there are enough grid
    # steps for double buffering to overlap DMA with compute.
    def _nsteps(tb):
        return _cdiv(B, tb) * _cdiv(size, tile_f)
    while _nsteps(tile_b) < 16 and tile_b > sublane:
        tile_b = max(sublane, _round_down(tile_b // 2, sublane))

    g2d = gate_param.reshape(1, size)      # 2-D so the gate sits on the lane axis

    # Feature axis outermost, batch innermost: the gate block index (0, j) is
    # constant across the whole inner sweep, so its DMA isn't re-issued.
    grid = (_cdiv(size, tile_f), _cdiv(B, tile_b))

    out2d = pl.pallas_call(
        _gate_kernel,
        out_shape=jax.ShapeDtypeStruct((B, size), x2d.dtype),
        grid_spec=pltpu.PrefetchScalarGridSpec(
            num_scalar_prefetch=0,
            grid=grid,
            in_specs=[
                pl.BlockSpec((tile_b, tile_f), lambda j, i: (i, j)),  # x tile
                pl.BlockSpec((1, tile_f), lambda j, i: (0, j)),       # gate row
            ],
            out_specs=pl.BlockSpec((tile_b, tile_f), lambda j, i: (i, j)),
        ),
        compiler_params=pltpu.CompilerParams(
            # Both axes are independent -> let megacore shard whichever has
            # depth; near-zero effect (and harmless) on single-TC v5e/v6e.
            dimension_semantics=("parallel", "parallel"),
            # Explicit scoped-VMEM budget: above v5e's 16 MiB default, well
            # inside v7x's 64 MiB physical VMEM.
            vmem_limit_bytes=32 * 1024 * 1024,
        ),
    )(x2d, g2d)
    return out2d.reshape(orig_shape)


if __name__ == "__main__":
    key = jax.random.PRNGKey(0)
    k1, k2, k3, k4 = jax.random.split(key, 4)

    # --- f32 path, lane-aligned shapes, torch-style init gate = ones(size) ---
    size = 256
    gate_param = jnp.ones((size,), dtype=jnp.float32)
    x = jax.random.normal(k1, (8, size), dtype=jnp.float32)
    out = jax.block_until_ready(gate_forward(x, gate_param))
    ref = x * jax.nn.sigmoid(gate_param)
    assert out.shape == x.shape
    assert jnp.allclose(out, ref, atol=1e-5, rtol=1e-5)

    # --- bf16 path (exercises the native-dtype multiply: x is never upcast) ---
    xb = jax.random.normal(k2, (16, size), dtype=jnp.float32).astype(jnp.bfloat16)
    outb = jax.block_until_ready(gate_forward(xb, gate_param))
    refb = xb * jax.nn.sigmoid(gate_param).astype(jnp.bfloat16)
    assert outb.shape == xb.shape
    assert jnp.allclose(outb.astype(jnp.float32), refb.astype(jnp.float32),
                        atol=1e-2, rtol=1e-2)

    # --- non-aligned shapes: leading dims + feature dim not a multiple of 128,
    #     exercising the cdiv grid with masked edge blocks ---
    size2 = 300
    gate2 = jax.random.normal(k3, (size2,), dtype=jnp.float32)
    x2 = jax.random.normal(k4, (2, 5, size2), dtype=jnp.float32)
    out2 = jax.block_until_ready(gate_forward(x2, gate2))
    ref2 = x2 * jax.nn.sigmoid(gate2)
    assert out2.shape == x2.shape
    assert jnp.allclose(out2, ref2, atol=1e-5, rtol=1e-5)

    print("KERNEL_OK")
</pallas_src>

<mosaic_0001>
module attributes {stable_mosaic.version = 11 : i64} {
  func.func @_gate_kernel(%arg0: i32, %arg1: i32, %arg2: memref<8x256xf32, #tpu.memory_space<vmem>>, %arg3: memref<1x256xf32, #tpu.memory_space<vmem>>, %arg4: memref<8x256xf32, #tpu.memory_space<vmem>>) attributes {dimension_semantics = [#tpu.dimension_semantics<parallel>, #tpu.dimension_semantics<parallel>], iteration_bounds = array<i64: 1, 1>, scalar_prefetch = 0 : i64, scratch_operands = 0 : i64, tpu.core_type = #tpu.core_type<tc>, window_params = [{transform_indices = @transform_0, window_bounds = array<i64: 8, 256>}, {transform_indices = @transform_1, window_bounds = array<i64: 1, 256>}, {transform_indices = @transform_2, window_bounds = array<i64: 8, 256>}]} {
    %c0 = arith.constant 0 : index
    %c0_0 = arith.constant 0 : index
    %0 = vector.load %arg3[%c0, %c0_0] : memref<1x256xf32, #tpu.memory_space<vmem>>, vector<1x256xf32>
    %1 = arith.negf %0 : vector<1x256xf32>
    %2 = math.exp %1 : vector<1x256xf32>
    %cst = arith.constant 1.000000e+00 : f32
    %3 = vector.broadcast %cst : f32 to vector<1x256xf32>
    %4 = arith.addf %3, %2 : vector<1x256xf32>
    %5 = arith.divf %3, %4 : vector<1x256xf32>
    %c0_1 = arith.constant 0 : index
    %c0_2 = arith.constant 0 : index
    %6 = vector.load %arg2[%c0_1, %c0_2] : memref<8x256xf32, #tpu.memory_space<vmem>>, vector<8x256xf32>
    %7 = vector.broadcast %5 : vector<1x256xf32> to vector<8x256xf32>
    %8 = arith.mulf %6, %7 : vector<8x256xf32>
    %c0_3 = arith.constant 0 : index
    %c0_4 = arith.constant 0 : index
    %9 = vector.load %arg4[%c0_3, %c0_4] : memref<8x256xf32, #tpu.memory_space<vmem>>, vector<8x256xf32>
    tpu.vector_store %arg4[%c0_3, %c0_4], %8 {strides = array<i32>} : memref<8x256xf32, #tpu.memory_space<vmem>>, vector<8x256xf32>,
    return
  }
  func.func @transform_0(%arg0: i32, %arg1: i32) -> (i32, i32) {
    %c0_i32 = arith.constant 0 : i32
    return %arg1, %arg0 : i32, i32
  }
  func.func @transform_1(%arg0: i32, %arg1: i32) -> (i32, i32) {
    %c0_i32 = arith.constant 0 : i32
    %c0_i32_0 = arith.constant 0 : i32
    return %c0_i32, %arg0 : i32, i32
  }
  func.func @transform_2(%arg0: i32, %arg1: i32) -> (i32, i32) {
    %c0_i32 = arith.constant 0 : i32
    return %arg1, %arg0 : i32, i32
  }
}

</mosaic_0001>

<bundles_post_ra>
// kernel: tpu_custom_call.1
= control target key start
LH: loop header
LB: loop body
LE: loop exit
PB: predicated region body
PF: predicated region fallthrough
CT: control target
= control target key end

     0   :  { %7 = vsyncpa [#allocation3], 0  ;;  %s177_s0 = inlined_call_operand.hbm [shape: f32[8,256], index: 0, kind: input, shape index: {}]   ;;  %s178_s1 = inlined_call_operand.hbm [shape: f32[1,256], index: 1, kind: input, shape index: {}]   ;;  %s179_s2 = inlined_call_operand.hbm [shape: f32[8,256], index: 2, kind: output, shape index: {}]  }
   0x1   :  { %8 = vsyncpa [#allocation6], 0 }
   0x2   :  { %9 = vsyncpa [#allocation4], 0  ;;  %s150_s9 = smov [#allocation2]   ;;  %s151_s11 = smov [#allocation5]  }
   0x3   :  { %s16_s10 = sshll.u32 %s150_s9, 4  ;;  %s26_s12 = sshll.u32 %s151_s11, 4  ;;  %s17_s10 = int_to_ptr.vmem [resolvable:$true] %s16_s10  ;;  %s27_s12 = int_to_ptr.vmem [resolvable:$true] %s26_s12 }
   0x4   :  { %s92_s13 = scalar_lea.vmem %s17_s10, 256  ;;  %p97_p1 = scmp.lt.s32.totalorder %s17_s10, %s17_s10 }
   0x5   :  { %p93_p0 = scmp.ne.s32.totalorder %s17_s10, %s92_s13  ;;  %p98_p2 = scmp.lt.s32.totalorder %s92_s13, %s92_s13 }
   0x7   :  { %p99_p3 = por %p98_p2, %p97_p1 }
   0x9   :  { %p100_p4 = pnand %p99_p3, %p93_p0 }
   0xb   :  { %103 = shalt.err (!%p100_p4)
}
   0xc   :  { %19 = dma.hbm_to_vmem [thread:$0]  %s177_s0, 256, %s17_s10, [#allocation3]  }
   0xd   :  { %s112_s16 = scalar_lea.vmem %s27_s12, 32  ;;  %p117_p6 = scmp.lt.s32.totalorder %s27_s12, %s27_s12 }
   0xe   :  { %p113_p5 = scmp.ne.s32.totalorder %s27_s12, %s112_s16  ;;  %p118_p7 = scmp.lt.s32.totalorder %s112_s16, %s112_s16 }
  0x10   :  { %p119_p8 = por %p118_p7, %p117_p6 }
  0x12   :  { %p120_p9 = pnand %p119_p8, %p113_p5 }
  0x14   :  { %123 = shalt.err (!%p120_p9)
}
  0x15   :  { %29 = dma.hbm_to_vmem [thread:$0]  %s178_s1, 32, %s27_s12, [#allocation6]  }
  0x16   :  { %144 = dma.done.wait [#allocation3], 256  }
  0x17   :  { %145 = vsyncadd [#allocation3], 4294967040 }
  0x18   :  { %146 = dma.done.wait [#allocation6], 32  }
  0x19   :  { %147 = vsyncadd [#allocation6], 4294967264  ;;  %v36_v0 = vld [vmem:[#allocation5] sm:$0x3]  ;;  %v46_v4 = vlaneseq  ;;  %v43_v9 = vld [vmem:[#allocation2] sm:$0xff]  ;;  %s152_s0 = smov [#allocation7]  }
  0x1a   :  { %v76_v1 = vmul.f32 -1.442695, %v36_v0  ;;  %v44_v10 = vld [vmem:[#allocation2 + $0x8] sm:$0xff]  ;;  %s66_s19 = sshll.u32 %s152_s0, 4  ;;  %s67_s19 = int_to_ptr.vmem [resolvable:$true] %s66_s19 }
  0x1b   :  { %v47_v5 = vshrl.u32 %v46_v4, 7  ;;  %s124_s1 = scalar_lea.vmem %s67_s19, 256  ;;  %p129_p11 = scmp.lt.s32.totalorder %s67_s19, %s67_s19 }
  0x1c   :  { %80 = vpow2.f32 %v76_v1  ;;  %p125_p10 = scmp.ne.s32.totalorder %s67_s19, %s124_s1  ;;  %p130_p12 = scmp.lt.s32.totalorder %s124_s1, %s124_s1 }
  0x1d   :  { %v48_v6 = vsub.s32 0, %v47_v5  ;;  %v52_v7 = vsub.s32 1, %v47_v5 }
  0x1e   :  { %p131_p13 = por %p130_p12, %p129_p11 }
  0x20   :  { %p132_p0 = pnand %p131_p13, %p125_p10 }
  0x29   :  { %v81_v2 = vpop.eup %80 }
  0x2a   :  { %v40_v3 = vadd.f32 1.0, %v81_v2 }
  0x2c   :  { %82 = vrcp.f32 %v40_v3 }
  0x39   :  { %v83_v8 = vpop.eup %82 }
  0x3a   :  { %v49_v11 = vrot.slane %v83_v8, %v48_v6  ;;  %v53_v12 = vrot.slane %v83_v8, %v52_v7 }
  0x3c   :  { %v56_v13 = vmul.f32 %v49_v11, %v43_v9  ;;  %v57_v14 = vmul.f32 %v53_v12, %v44_v10 }
  0x3e   :  { %58 = vst [vmem:[#allocation7] sm:$0xff] %v56_v13  ;;  %59 = vst [vmem:[#allocation7 + $0x8] sm:$0xff] %v57_v14 }
  0x3f   :  { %135 = shalt.err (!%p132_p0)
}
  0x40   :  { %69 = dma.vmem_to_hbm [thread:$0]  %s67_s19, 256, %s179_s2, [#allocation4]  }
  0x41   :  { %148 = dma.done.wait [#allocation4], 256  }
  0x42   :  { %149 = vsyncadd [#allocation4], 4294967040 }
  0x43   :  { %73 = vsyncpa [#allocation3], 1 }
  0x44   :  { %74 = vsyncpa [#allocation6], 1 }
  0x45   :  { %75 = vsyncpa [#allocation4], 1 }

</bundles_post_ra>
